<compile_context>
chip_gen: v6e
topology: v6e:2x2x1
jax: 0.10.0
libtpu: 0.0.40
codegen_flags: <defaults>
</compile_context>

<pallas_src>
import functools

import jax
import jax.numpy as jnp
from jax import lax
from jax.experimental import pallas as pl
from jax.experimental.pallas import tpu as pltpu

LANE = 128          # lane-pad feature dims to this width (always +1 spare column)
NODE_ALIGN = 128    # node axis padded to a multiple of this
NEG_BIG = 1e30      # softmax mask value (exp underflows to exactly 0 in f32)


def _round_up(v, m):
    return (v + m - 1) // m * m


def _feat_pad(d):
    # Always leave at least one zero lane-pad column (used as the denominator column).
    return _round_up(d + 1, LANE)


def _pick_tile(n, preferred, multiple):
    """Largest t <= preferred with n % t == 0 and t % multiple == 0 (n is a
    multiple of `multiple`, so this always succeeds with t >= multiple)."""
    t = min(preferred, n)
    t -= t % multiple
    while t >= multiple:
        if n % t == 0:
            return t
        t -= multiple
    return n


def _chip_defaults():
    """(vmem_limit_bytes, dst_tile) per TPU generation."""
    kind = ""
    try:
        kind = jax.devices()[0].device_kind.lower()
    except Exception:
        pass
    if "v7" in kind:
        return 32 * 1024 * 1024, 256          # v7x: 64 MiB physical VMEM per TC
    if any(t in kind for t in ("v4", "v5", "v6")):
        return 64 * 1024 * 1024, 512          # 128 MiB physical VMEM
    return 32 * 1024 * 1024, 256              # unknown: stay conservative


# ----------------------------- kernels ------------------------------------ #

def gat_precompute_kernel(x_ref, w_ref, asrc_ref, h_ref, arow_ref, *, denom_col):
    """h = x @ W (bf16 MXU, f32 acc), per-source attention scalar row, and a 1.0
    written into the spare lane-pad column so the attention matmul yields the
    softmax denominator for free."""
    h = jnp.dot(x_ref[...], w_ref[...], preferred_element_type=jnp.float32)  # (TN, Dp)
    # a_src directly as a lane-dense (1, TN) row (no transpose / no lane-1 store).
    arow_ref[...] = lax.dot_general(asrc_ref[...], h,
                                    dimension_numbers=(((1,), (1,)), ((), ())),
                                    preferred_element_type=jnp.float32)
    col = lax.broadcasted_iota(jnp.int32, h.shape, 1)
    h = jnp.where(col == denom_col, 1.0, h)              # denominator column
    h_ref[...] = h.astype(h_ref.dtype)                   # bf16 for the attn @ h matmul


def gat_attention_kernel(adj_ref, hall_ref, hdst_ref, asrc_ref, adst_ref, b_ref,
                         o_ref, *, denom_col, apply_act):
    """One tile of destination nodes: masked softmax over all sources + aggregation.
    adj is int8 {0,1}; mask is a single compare+select; the row-sum comes out of
    the MXU via the ones-column of h (no TM*N cross-lane reduction for the sum)."""
    # Per-dst attention scalar from the resident bf16 h tile (TM*Dout VPU work).
    adst = jnp.sum(hdst_ref[...].astype(jnp.float32) * adst_ref[...],
                   axis=-1, keepdims=True)                           # (TM, 1)
    e = adst + asrc_ref[...]                                         # (TM, N)
    e = jnp.where(e >= 0, e, 0.2 * e)                                # LeakyReLU(0.2)
    e = jnp.where(adj_ref[...] != 0, e, -NEG_BIG)                    # mask non-edges
    e_max = jnp.max(e, axis=-1, keepdims=True)                       # self-loops => finite
    p = jnp.exp(e - e_max)                                           # masked entries -> 0
    # Unnormalized aggregate on the MXU (bf16 inputs, f32 accumulate).
    agg = jnp.dot(p.astype(jnp.bfloat16), hall_ref[...],
                  preferred_element_type=jnp.float32)                # (TM, Dp)
    col = lax.broadcasted_iota(jnp.int32, agg.shape, 1)
    denom = jnp.sum(jnp.where(col == denom_col, agg, 0.0),
                    axis=-1, keepdims=True)                          # row-sum, >= 1
    out = agg * pl.reciprocal(denom, approx=True) + b_ref[...]
    out = jnp.where(col == denom_col, 0.0, out)                      # scrub denom column
    if apply_act:
        out = jnp.maximum(out, 0.0)                                  # ReLU between layers
    o_ref[...] = out.astype(o_ref.dtype)


def pool_kernel(pm_ref, x_ref, o_ref):
    # global_add_pool: graph_emb[g] = sum_{n: batch[n]==g} x[n] == P @ x,
    # streamed over the node axis with an accumulating f32 output.
    @pl.when(pl.program_id(0) == 0)
    def _():
        o_ref[...] = jnp.zeros_like(o_ref)
    o_ref[...] += jnp.dot(pm_ref[...], x_ref[...].astype(jnp.bfloat16),
                          preferred_element_type=jnp.float32)


# ----------------------------- wrappers ------------------------------------ #

def gat_layer(h_in, w, att_src, att_dst, bias, adj_i8, *, denom_col, apply_act,
              out_dtype, vmem_limit, dst_tile):
    N, Dinp = h_in.shape
    Doutp = w.shape[1]
    cp = pltpu.CompilerParams(dimension_semantics=("parallel",),
                              vmem_limit_bytes=vmem_limit)

    # phase 1: linear transform + source attention scalars, tiled over nodes
    TN = _pick_tile(N, 512, LANE)
    pre = functools.partial(gat_precompute_kernel, denom_col=denom_col)
    h, a_src = pl.pallas_call(
        pre,
        out_shape=(jax.ShapeDtypeStruct((N, Doutp), jnp.bfloat16),
                   jax.ShapeDtypeStruct((1, N), jnp.float32)),
        grid=(N // TN,),
        in_specs=[pl.BlockSpec((TN, Dinp), lambda i: (i, 0)),
                  pl.BlockSpec((Dinp, Doutp), lambda i: (0, 0)),
                  pl.BlockSpec((1, Doutp), lambda i: (0, 0))],
        out_specs=(pl.BlockSpec((TN, Doutp), lambda i: (i, 0)),
                   pl.BlockSpec((1, TN), lambda i: (0, i))),
        compiler_params=cp,
    )(h_in, w, att_src)

    # phase 2: attention, tiled over destination nodes (int8 adjacency streamed).
    # TODO(synk): on v7x for large N, single-buffer the grid-invariant inputs
    # (pipeline_mode=pl.Buffered(1)) and switch to an online-softmax source-tiled
    # variant once resident h + double-buffered adj tiles approach VMEM.
    TM = _pick_tile(N, dst_tile, 32)   # multiple of 32 keeps int8 sublane packing legal
    attn = functools.partial(gat_attention_kernel, denom_col=denom_col,
                             apply_act=apply_act)
    return pl.pallas_call(
        attn,
        out_shape=jax.ShapeDtypeStruct((N, Doutp), out_dtype),
        grid=(N // TM,),
        in_specs=[pl.BlockSpec((TM, N), lambda i: (i, 0)),       # adjacency tile (int8)
                  pl.BlockSpec((N, Doutp), lambda i: (0, 0)),    # h, all sources (bf16)
                  pl.BlockSpec((TM, Doutp), lambda i: (i, 0)),   # h, dst tile (bf16)
                  pl.BlockSpec((1, N), lambda i: (0, 0)),        # a_src row
                  pl.BlockSpec((1, Doutp), lambda i: (0, 0)),    # att_dst vector
                  pl.BlockSpec((1, Doutp), lambda i: (0, 0))],   # bias
        out_specs=pl.BlockSpec((TM, Doutp), lambda i: (i, 0)),
        compiler_params=cp,
    )(adj_i8, h, h, a_src, att_dst, bias)


def global_add_pool(pool_bf16, h, *, vmem_limit, node_tile=512):
    G, N = pool_bf16.shape
    D = h.shape[1]
    TK = _pick_tile(N, node_tile, LANE)
    return pl.pallas_call(
        pool_kernel,
        out_shape=jax.ShapeDtypeStruct((G, D), jnp.float32),
        grid=(N // TK,),
        in_specs=[pl.BlockSpec((G, TK), lambda k: (0, k)),
                  pl.BlockSpec((TK, D), lambda k: (k, 0))],
        out_specs=pl.BlockSpec((G, D), lambda k: (0, 0)),
        compiler_params=pltpu.CompilerParams(dimension_semantics=("arbitrary",),
                                             vmem_limit_bytes=vmem_limit),
    )(pool_bf16, h)


def graph_encoder_forward(x_pad, adj_i8, pool_bf16, params_pad, denom_cols, dim_out,
                          *, vmem_limit, dst_tile):
    """Full GraphEncoder forward: stacked GATConv layers + global add pooling."""
    n_layers = len(params_pad)
    h = x_pad
    for li, (w, a_s, a_d, b) in enumerate(params_pad):
        last = li == n_layers - 1
        h = gat_layer(h, w, a_s, a_d, b, adj_i8,
                      denom_col=denom_cols[li],
                      apply_act=not last,                       # ReLU except after last
                      out_dtype=jnp.float32 if last else jnp.bfloat16,
                      vmem_limit=vmem_limit, dst_tile=dst_tile)
    emb = global_add_pool(pool_bf16, h, vmem_limit=vmem_limit)
    return emb[:, :dim_out]                                     # drop lane padding


# ----------------------------- setup --------------------------------------- #

def glorot(key, shape):
    fan_in, fan_out = shape[-2], shape[-1]
    lim = jnp.sqrt(6.0 / (fan_in + fan_out))
    return jax.random.uniform(key, shape, jnp.float32, -lim, lim)


def make_params(key, dim_in, dim_hidden, dim_out, num_layers):
    dims = [dim_in] + [dim_hidden] * (num_layers - 1) + [dim_out]
    params = []
    for li in range(num_layers):
        din, dout = dims[li], dims[li + 1]
        key, k1, k2, k3 = jax.random.split(key, 4)
        params.append((glorot(k1, (din, dout)),
                       glorot(k2, (1, dout)),
                       glorot(k3, (1, dout)),
                       jnp.zeros((1, dout), jnp.float32)))   # GATConv bias init = 0
    return params


def _pad2(a, rows, cols):
    r, c = a.shape
    return jnp.pad(a, ((0, rows - r), (0, cols - c)))


def pad_params(params):
    """Zero-pad per-layer tensors to lane-dense dims (with a spare denom column);
    weights cast to bf16 so every x @ W runs on the bf16 MXU path."""
    padded, denom_cols = [], []
    for (w, a_s, a_d, b) in params:
        din, dout = w.shape
        dinp, doutp = _feat_pad(din), _feat_pad(dout)
        padded.append((_pad2(w, dinp, doutp).astype(jnp.bfloat16),
                       _pad2(a_s, 1, doutp),
                       _pad2(a_d, 1, doutp),
                       _pad2(b, 1, doutp)))
        denom_cols.append(dout)            # first zero-pad column holds the 1.0 denom
    return padded, denom_cols


def build_dense_adjacency(edge_index, num_nodes):
    """adj[dst, src] = 1 for each edge, plus self-loops (GATConv default)."""
    src, dst = edge_index[0], edge_index[1]
    adj = jnp.zeros((num_nodes, num_nodes), jnp.float32)
    adj = adj.at[dst, src].set(1.0)
    adj = adj + jnp.eye(num_nodes, dtype=jnp.float32)
    return jnp.minimum(adj, 1.0)


def build_pool_matrix(batch_vec, num_graphs):
    """P[g, n] = 1 if node n belongs to graph g (for global_add_pool)."""
    return (batch_vec[None, :] == jnp.arange(num_graphs)[:, None]).astype(jnp.float32)


def reference_forward(x, adj, pool_mat, params):
    """Pure-JAX (f32, exact) reference for numerical sanity."""
    n_layers = len(params)
    h = x
    for li, (w, a_s, a_d, b) in enumerate(params):
        hw = h @ w
        asrc = (hw * a_s).sum(-1)
        adst = (hw * a_d).sum(-1)
        e = adst[:, None] + asrc[None, :]
        e = jnp.where(e >= 0, e, 0.2 * e)
        e = jnp.where(adj > 0, e, -jnp.inf)
        attn = jax.nn.softmax(e, axis=-1)
        h = attn @ hw + b
        if li < n_layers - 1:
            h = jnp.maximum(h, 0.0)
    return pool_mat @ h


# ----------------------------- main ----------------------------------------- #

if __name__ == "__main__":
    # Small config: dim_in=16, hidden=32, dim_out=16, 2 GAT layers,
    # 2 graphs x 4 nodes = 8 nodes, bidirectional ring topology per graph.
    key = jax.random.PRNGKey(0)
    dim_in, dim_hidden, dim_out, num_layers = 16, 32, 16, 2
    num_nodes, num_graphs = 8, 2

    key, kx = jax.random.split(key)
    x = jax.random.normal(kx, (num_nodes, dim_in), jnp.float32)

    src = jnp.array([0, 1, 2, 3, 1, 2, 3, 0, 4, 5, 6, 7, 5, 6, 7, 4], jnp.int32)
    dst = jnp.array([1, 2, 3, 0, 0, 1, 2, 3, 5, 6, 7, 4, 4, 5, 6, 7], jnp.int32)
    edge_index = jnp.stack([src, dst], axis=0)
    batch_vec = jnp.array([0, 0, 0, 0, 1, 1, 1, 1], jnp.int32)

    adj = build_dense_adjacency(edge_index, num_nodes)      # f32 {0,1}, self loops
    pool_mat = build_pool_matrix(batch_vec, num_graphs)     # f32 {0,1}
    params = make_params(key, dim_in, dim_hidden, dim_out, num_layers)

    vmem_limit, dst_tile = _chip_defaults()

    # Kernel-side operands: node axis padded to a lane-dense multiple (pad nodes
    # have zero adjacency rows/cols and zero pool columns, so they contribute
    # nothing), lane-padded bf16 features/weights, int8 adjacency, bf16 pooling.
    N_pad = _round_up(num_nodes, NODE_ALIGN)
    x_pad = _pad2(x, N_pad, _feat_pad(dim_in)).astype(jnp.bfloat16)
    adj_i8 = _pad2(adj, N_pad, N_pad).astype(jnp.int8)
    pool_bf16 = _pad2(pool_mat, num_graphs, N_pad).astype(jnp.bfloat16)
    params_pad, denom_cols = pad_params(params)

    graph_emb = graph_encoder_forward(x_pad, adj_i8, pool_bf16, params_pad,
                                      denom_cols, dim_out,
                                      vmem_limit=vmem_limit, dst_tile=dst_tile)
    jax.block_until_ready(graph_emb)

    assert graph_emb.shape == (num_graphs, dim_out)
    assert bool(jnp.all(jnp.isfinite(graph_emb)))

    # numerical sanity vs an exact f32 reference (bf16 weights/activations, bf16
    # attention weights and approx reciprocal -> scale-aware tolerance)
    ref = reference_forward(x, adj, pool_mat, params)
    max_err = float(jnp.max(jnp.abs(graph_emb - ref)))
    scale = max(float(jnp.max(jnp.abs(ref))), 1.0)
    assert max_err < 0.05 * scale + 0.05, f"mismatch vs reference: {max_err} (scale {scale})"

    print("KERNEL_OK")
</pallas_src>

<mosaic_0001>
module attributes {stable_mosaic.version = 11 : i64} {
  func.func @gat_precompute_kernel(%arg0: i32, %arg1: memref<128x128xbf16, #tpu.memory_space<vmem>>, %arg2: memref<128x128xbf16, #tpu.memory_space<vmem>>, %arg3: memref<1x128xf32, #tpu.memory_space<vmem>>, %arg4: memref<128x128xbf16, #tpu.memory_space<vmem>>, %arg5: memref<1x128xf32, #tpu.memory_space<vmem>>) attributes {dimension_semantics = [#tpu.dimension_semantics<parallel>], iteration_bounds = array<i64: 1>, scalar_prefetch = 0 : i64, scratch_operands = 0 : i64, tpu.core_type = #tpu.core_type<tc>, window_params = [{transform_indices = @transform_0, window_bounds = array<i64: 128, 128>}, {pipeline_mode = #tpu.pipeline_mode<synchronous>, transform_indices = @transform_1, window_bounds = array<i64: 128, 128>}, {pipeline_mode = #tpu.pipeline_mode<synchronous>, transform_indices = @transform_2, window_bounds = array<i64: 1, 128>}, {transform_indices = @transform_3, window_bounds = array<i64: 128, 128>}, {transform_indices = @transform_4, window_bounds = array<i64: 1, 128>}]} {
    %c0 = arith.constant 0 : index
    %c0_0 = arith.constant 0 : index
    %0 = vector.load %arg1[%c0, %c0_0] : memref<128x128xbf16, #tpu.memory_space<vmem>>, vector<128x128xbf16>
    %c0_1 = arith.constant 0 : index
    %c0_2 = arith.constant 0 : index
    %1 = vector.load %arg2[%c0_1, %c0_2] : memref<128x128xbf16, #tpu.memory_space<vmem>>, vector<128x128xbf16>
    %cst = arith.constant dense<0.000000e+00> : vector<128x128xf32>
    %2 = tpu.matmul %0, %1, %cst {dimension_numbers = #tpu.dot_dimension_numbers<[1], [0], [0], [1], [0, 0, 1, 1], [], []>} : vector<128x128xbf16>, vector<128x128xbf16>, vector<128x128xf32> -> vector<128x128xf32>
    %c0_3 = arith.constant 0 : index
    %c0_4 = arith.constant 0 : index
    %3 = vector.load %arg3[%c0_3, %c0_4] : memref<1x128xf32, #tpu.memory_space<vmem>>, vector<1x128xf32>
    %cst_5 = arith.constant dense<0.000000e+00> : vector<1x128xf32>
    %4 = tpu.matmul %3, %2, %cst_5 {dimension_numbers = #tpu.dot_dimension_numbers<[1], [1], [0], [0], [0, 0, 1, 0], [], []>} : vector<1x128xf32>, vector<128x128xf32>, vector<1x128xf32> -> vector<1x128xf32>
    %c0_6 = arith.constant 0 : index
    %c0_7 = arith.constant 0 : index
    %5 = vector.load %arg5[%c0_6, %c0_7] : memref<1x128xf32, #tpu.memory_space<vmem>>, vector<1x128xf32>
    tpu.vector_store %arg5[%c0_6, %c0_7], %4 {strides = array<i32>} : memref<1x128xf32, #tpu.memory_space<vmem>>, vector<1x128xf32>,
    %6 = tpu.iota {dimensions = array<i32: 1>} : vector<128x128xi32>
    %c32_i32 = arith.constant 32 : i32
    %7 = vector.broadcast %c32_i32 : i32 to vector<128x128xi32>
    %8 = arith.cmpi eq, %6, %7 : vector<128x128xi32>
    %cst_8 = arith.constant 1.000000e+00 : f32
    %9 = vector.broadcast %cst_8 : f32 to vector<128x128xf32>
    %10 = arith.select %8, %9, %2 : vector<128x128xi1>, vector<128x128xf32>
    %11 = arith.truncf %10 : vector<128x128xf32> to vector<128x128xbf16>
    %c0_9 = arith.constant 0 : index
    %c0_10 = arith.constant 0 : index
    %12 = vector.load %arg4[%c0_9, %c0_10] : memref<128x128xbf16, #tpu.memory_space<vmem>>, vector<128x128xbf16>
    tpu.vector_store %arg4[%c0_9, %c0_10], %11 {strides = array<i32>} : memref<128x128xbf16, #tpu.memory_space<vmem>>, vector<128x128xbf16>,
    return
  }
  func.func @transform_0(%arg0: i32) -> (i32, i32) {
    %c0_i32 = arith.constant 0 : i32
    %c0_i32_0 = arith.constant 0 : i32
    return %arg0, %c0_i32 : i32, i32
  }
  func.func @transform_1(%arg0: i32) -> (i32, i32) {
    %c0_i32 = arith.constant 0 : i32
    %c0_i32_0 = arith.constant 0 : i32
    %c0_i32_1 = arith.constant 0 : i32
    return %c0_i32, %c0_i32_0 : i32, i32
  }
  func.func @transform_2(%arg0: i32) -> (i32, i32) {
    %c0_i32 = arith.constant 0 : i32
    %c0_i32_0 = arith.constant 0 : i32
    %c0_i32_1 = arith.constant 0 : i32
    return %c0_i32, %c0_i32_0 : i32, i32
  }
  func.func @transform_3(%arg0: i32) -> (i32, i32) {
    %c0_i32 = arith.constant 0 : i32
    %c0_i32_0 = arith.constant 0 : i32
    return %arg0, %c0_i32 : i32, i32
  }
  func.func @transform_4(%arg0: i32) -> (i32, i32) {
    %c0_i32 = arith.constant 0 : i32
    %c0_i32_0 = arith.constant 0 : i32
    return %c0_i32, %arg0 : i32, i32
  }
}

</mosaic_0001>

<bundles_post_ra>
// kernel: tpu_custom_call.1
= control target key start
LH: loop header
LB: loop body
LE: loop exit
PB: predicated region body
PF: predicated region fallthrough
CT: control target
= control target key end

     0   :  { %10 = vsyncpa [#allocation3], 0  ;;  %s888_s0 = inlined_call_operand.hbm [shape: bf16[128,128], index: 0, kind: input, shape index: {}]   ;;  %s889_s1 = inlined_call_operand.hbm [shape: bf16[128,128], index: 1, kind: input, shape index: {}]   ;;  %s890_s2 = inlined_call_operand.vmem [shape: f32[1,128], index: 2, kind: input, shape index: {}]   ;;  %s891_s3 = inlined_call_operand.hbm [shape: bf16[128,128], index: 3, kind: output, shape index: {0}]   ;;  %s892_s4 = inlined_call_operand.hbm [shape: f32[1,128], index: 4, kind: output, shape index: {1}]  }
   0x1   :  { %11 = vsyncpa [#allocation6], 0 }
   0x2   :  { %12 = vsyncpa [#allocation4], 0 }
   0x3   :  { %13 = vsyncpa [#allocation9], 0  ;;  %s782_s15 = smov [#allocation2]  }
   0x4   :  { %s19_s16 = sshll.u32 %s782_s15, 4  ;;  %s20_s16 = int_to_ptr.vmem [resolvable:$true] %s19_s16 }
   0x5   :  { %s702_s17 = scalar_lea.vmem %s20_s16, 1024  ;;  %p707_p1 = scmp.lt.s32.totalorder %s20_s16, %s20_s16 }
   0x6   :  { %p703_p0 = scmp.ne.s32.totalorder %s20_s16, %s702_s17  ;;  %p708_p2 = scmp.lt.s32.totalorder %s702_s17, %s702_s17 }
   0x8   :  { %p709_p3 = por %p708_p2, %p707_p1 }
   0xa   :  { %p710_p4 = pnand %p709_p3, %p703_p0 }
   0xc   :  { %713 = shalt.err (!%p710_p4)
}
   0xd   :  { %s783_s18 = smov 64   ;;  %s784_s19 = smov 4  }
   0xe   :  { %25 = dma.hbm_to_vmem [thread:$0]  %s888_s0, 1024, %s20_s16, [#allocation3], %s783_s18, %s783_s18, %s784_s19  }
   0xf   :  { %s785_s22 = smov [#allocation5]  }
  0x10   :  { %s31_s23 = sshll.u32 %s785_s22, 4  ;;  %s32_s23 = int_to_ptr.vmem [resolvable:$true] %s31_s23 }
  0x11   :  { %s722_s24 = scalar_lea.vmem %s32_s23, 1024  ;;  %p727_p6 = scmp.lt.s32.totalorder %s32_s23, %s32_s23 }
  0x12   :  { %p723_p5 = scmp.ne.s32.totalorder %s32_s23, %s722_s24  ;;  %p728_p7 = scmp.lt.s32.totalorder %s722_s24, %s722_s24 }
  0x14   :  { %p729_p8 = por %p728_p7, %p727_p6 }
  0x16   :  { %p730_p9 = pnand %p729_p8, %p723_p5 }
  0x18   :  { %733 = shalt.err (!%p730_p9)
}
  0x19   :  { %37 = dma.hbm_to_vmem [thread:$0]  %s889_s1, 1024, %s32_s23, [#allocation6], %s783_s18, %s783_s18, %s784_s19  }
  0x1a   :  { %774 = dma.done.wait [#allocation3], 1024  }
  0x1b   :  { %775 = vsyncadd [#allocation3], 4294966272 }
  0x1c   :  { %776 = dma.done.wait [#allocation6], 1024  }
  0x1d   :  { %777 = vsyncadd [#allocation6], 4294966272  ;;  %v678_v0 = vld [vmem:[#allocation5 + $0x38] sm:$0xff]   ;;  %v679_v1 = vld [vmem:[#allocation5 + $0x30] sm:$0xff]   ;;  %v786_v16 = vmov 0.0   ;;  %vm787_vm0 = vmmov 0   ;;  %v344_v17 = vlaneseq }
  0x1e   :  { %603 = vmatprep.subr.bf16.mxu0 %v678_v0  ;;  %v680_v2 = vld [vmem:[#allocation5 + $0x28] sm:$0xff]   ;;  %v681_v3 = vld [vmem:[#allocation5 + $0x20] sm:$0xff]   ;;  %v682_v5 = vld [vmem:[#allocation5 + $0x18] sm:$0xff]   ;;  %635 = vmatprep.subr.mxu1 %v786_v16  ;;  %s788_s27 = smov [#allocation7]  }
  0x1f   :  { %604 = vmatpush3.bf16.msra.mxu0 %v678_v0  ;;  %v686_v4 = vld [vmem:[#allocation2] sm:$0xff]   ;;  %v683_v6 = vld [vmem:[#allocation5 + $0x10] sm:$0xff]   ;;  %v684_v7 = vld [vmem:[#allocation5 + $0x8] sm:$0xff]   ;;  %667 = vmatprep.mubr.msk.f32.mxu1 %vm787_vm0, %v786_v16  ;;  %v345_v18 = vand.u32 127, %v344_v17  ;;  %s448_s28 = sshll.u32 %s788_s27, 4  ;;  %s449_s28 = int_to_ptr.vmem [resolvable:$true] %s448_s28 }
  0x20   :  { %605 = vmatprep.subr.bf16.mxu0 %v679_v1  ;;  %619 = vmatprep.mubr.bf16.mxu0 %v686_v4  ;;  %v685_v8 = vld [vmem:[#allocation5] sm:$0xff]   ;;  %v687_v9 = vld [vmem:[#allocation2 + $0x8] sm:$0xff]   ;;  %v688_v10 = vld [vmem:[#allocation2 + $0x10] sm:$0xff]   ;;  %s734_s29 = scalar_lea.vmem %s449_s28, 1024  ;;  %p739_p11 = scmp.lt.s32.totalorder %s449_s28, %s449_s28 }
  0x21   :  { %v689_v11 = vld [vmem:[#allocation2 + $0x18] sm:$0xff]   ;;  %v690_v12 = vld [vmem:[#allocation2 + $0x20] sm:$0xff]   ;;  %v691_v13 = vld [vmem:[#allocation2 + $0x28] sm:$0xff]   ;;  %vm346_vm1 = vcmp.eq.s32.totalorder %v345_v18, 32  ;;  %p735_p10 = scmp.ne.s32.totalorder %s449_s28, %s734_s29  ;;  %p740_p12 = scmp.lt.s32.totalorder %s734_s29, %s734_s29 }
  0x22   :  { %v692_v14 = vld [vmem:[#allocation2 + $0x30] sm:$0xff]   ;;  %v693_v15 = vld [vmem:[#allocation2 + $0x38] sm:$0xff]   ;;  %v272_v59 = vld [vmem:[%s890_s2] sm:$0x1] }
  0x23   :  { %606 = vmatpush3.bf16.msra.mxu0 %v679_v1  ;;  %p741_p13 = por %p740_p12, %p739_p11 }
  0x24   :  { %607 = vmatprep.subr.bf16.mxu0 %v680_v2 }
  0x25   :  { %p742_p0 = pnand %p741_p13, %p735_p10 }
  0x27   :  { %608 = vmatpush3.bf16.msra.mxu0 %v680_v2 }
  0x28   :  { %609 = vmatprep.subr.bf16.mxu0 %v681_v3 }
  0x2b   :  { %610 = vmatpush3.bf16.msra.mxu0 %v681_v3 }
  0x2c   :  { %611 = vmatprep.subr.bf16.mxu0 %v682_v5 }
  0x2f   :  { %612 = vmatpush3.bf16.msra.mxu0 %v682_v5 }
  0x30   :  { %613 = vmatprep.subr.bf16.mxu0 %v683_v6 }
  0x33   :  { %614 = vmatpush3.bf16.msra.mxu0 %v683_v6 }
  0x34   :  { %615 = vmatprep.subr.bf16.mxu0 %v684_v7 }
  0x37   :  { %616 = vmatpush3.bf16.msra.mxu0 %v684_v7 }
  0x38   :  { %617 = vmatprep.subr.bf16.mxu0 %v685_v8 }
  0x3b   :  { %618 = vmatpush3.bf16.msra.mxu0 %v685_v8 }
  0x3e   :  { %620 = vmatmul.mubr.bf16.vlgmr.msra.gmra.mxu0 %v687_v9 }
  0x3f   :  { %623 = vmatprep.mubr.bf16.mxu0 %v688_v10 }
  0x46   :  { %624 = vmatmul.mubr.bf16.gmra.mxu0 %v689_v11 }
  0x47   :  { %627 = vmatprep.mubr.bf16.mxu0 %v690_v12 }
  0x4e   :  { %628 = vmatmul.mubr.bf16.gmra.mxu0 %v691_v13 }
  0x4f   :  { %631 = vmatprep.mubr.bf16.mxu0 %v692_v14 }
  0x56   :  { %632 = vmatmul.mubr.bf16.gmra.mxu0 %v693_v15 }
  0xfe   :  { %v829_v19 = vpop.f32.mrf.mxu0 }
  0xff   :  { %v349_v22 = vsel %vm346_vm1, 1.0, %v829_v19 }
 0x100   :  { %v831_v20 = vpop.f32.mrf.mxu0 }
 0x101   :  { %v347_v26 = vsel %vm346_vm1, 1.0, %v831_v20 }
 0x102   :  { %v833_v21 = vpop.f32.mrf.mxu0 }
 0x103   :  { %v350_v23 = vsel %vm346_vm1, 1.0, %v833_v21 }
 0x104   :  { %v531_v24 = vpack.c.bf16 %v350_v23, %v349_v22  ;;  %v839_v25 = vpop.f32.mrf.mxu0 }
 0x105   :  { %v348_v27 = vsel %vm346_vm1, 1.0, %v839_v25 }
 0x106   :  { %563 = vst [vmem:[#allocation7 + $0x8] sm:$0xff] %v531_v24   ;;  %v526_v28 = vpack.c.bf16 %v348_v27, %v347_v26  ;;  %v625_v29 = vpop.f32.mrf.mxu0 }
 0x107   :  { %v353_v32 = vsel %vm346_vm1, 1.0, %v625_v29 }
 0x108   :  { %527 = vst [vmem:[#allocation7] sm:$0xff] %v526_v28   ;;  %v225_v30 = vpop.f32.mrf.mxu0 }
 0x109   :  { %v351_v36 = vsel %vm346_vm1, 1.0, %v225_v30 }
 0x10a   :  { %v626_v31 = vpop.f32.mrf.mxu0 }
 0x10b   :  { %v354_v33 = vsel %vm346_vm1, 1.0, %v626_v31 }
 0x10c   :  { %v541_v34 = vpack.c.bf16 %v354_v33, %v353_v32  ;;  %v228_v35 = vpop.f32.mrf.mxu0 }
 0x10d   :  { %v352_v37 = vsel %vm346_vm1, 1.0, %v228_v35 }
 0x10e   :  { %565 = vst [vmem:[#allocation7 + $0x18] sm:$0xff] %v541_v34   ;;  %v536_v38 = vpack.c.bf16 %v352_v37, %v351_v36  ;;  %v629_v39 = vpop.f32.mrf.mxu0 }
 0x10f   :  { %v357_v42 = vsel %vm346_vm1, 1.0, %v629_v39 }
 0x110   :  { %564 = vst [vmem:[#allocation7 + $0x10] sm:$0xff] %v536_v38   ;;  %v241_v40 = vpop.f32.mrf.mxu0 }
 0x111   :  { %v355_v46 = vsel %vm346_vm1, 1.0, %v241_v40 }
 0x112   :  { %v630_v41 = vpop.f32.mrf.mxu0 }
 0x113   :  { %v358_v43 = vsel %vm346_vm1, 1.0, %v630_v41 }
 0x114   :  { %v551_v44 = vpack.c.bf16 %v358_v43, %v357_v42  ;;  %v244_v45 = vpop.f32.mrf.mxu0 }
 0x115   :  { %v356_v47 = vsel %vm346_vm1, 1.0, %v244_v45 }
 0x116   :  { %567 = vst [vmem:[#allocation7 + $0x28] sm:$0xff] %v551_v44   ;;  %v546_v48 = vpack.c.bf16 %v356_v47, %v355_v46  ;;  %v633_v49 = vpop.f32.mrf.mxu0 }
 0x117   :  { %v361_v52 = vsel %vm346_vm1, 1.0, %v633_v49 }
 0x118   :  { %566 = vst [vmem:[#allocation7 + $0x20] sm:$0xff] %v546_v48   ;;  %v257_v50 = vpop.f32.mrf.mxu0 }
 0x119   :  { %v359_v56 = vsel %vm346_vm1, 1.0, %v257_v50 }
 0x11a   :  { %v634_v51 = vpop.f32.mrf.mxu0 }
 0x11b   :  { %v362_v53 = vsel %vm346_vm1, 1.0, %v634_v51  ;;  %636 = vmatpush3.xpose.msra.mxu1 %v634_v51 }
 0x11c   :  { %v561_v54 = vpack.c.bf16 %v362_v53, %v361_v52  ;;  %v260_v55 = vpop.f32.mrf.mxu0  ;;  %637 = vmatprep.subr.mxu1 %v786_v16 }
 0x11d   :  { %v360_v57 = vsel %vm346_vm1, 1.0, %v260_v55 }
 0x11e   :  { %569 = vst [vmem:[#allocation7 + $0x38] sm:$0xff] %v561_v54   ;;  %v556_v58 = vpack.c.bf16 %v360_v57, %v359_v56 }
 0x11f   :  { %638 = vmatpush3.xpose.msra.mxu1 %v633_v49 }
 0x120   :  { %568 = vst [vmem:[#allocation7 + $0x30] sm:$0xff] %v556_v58   ;;  %639 = vmatprep.subr.mxu1 %v786_v16 }
 0x123   :  { %640 = vmatpush3.xpose.msra.mxu1 %v260_v55 }
 0x124   :  { %641 = vmatprep.subr.mxu1 %v786_v16 }
 0x127   :  { %642 = vmatpush3.xpose.msra.mxu1 %v257_v50 }
 0x128   :  { %643 = vmatprep.subr.mxu1 %v786_v16 }
 0x12b   :  { %644 = vmatpush3.xpose.msra.mxu1 %v630_v41 }
 0x12c   :  { %645 = vmatprep.subr.mxu1 %v786_v16 }
 0x12f   :  { %646 = vmatpush3.xpose.msra.mxu1 %v629_v39 }
 0x130   :  { %647 = vmatprep.subr.mxu1 %v786_v16 }
 0x133   :  { %648 = vmatpush3.xpose.msra.mxu1 %v244_v45 }
 0x134   :  { %649 = vmatprep.subr.mxu1 %v786_v16 }
 0x137   :  { %650 = vmatpush3.xpose.msra.mxu1 %v241_v40 }
 0x138   :  { %651 = vmatprep.subr.mxu1 %v786_v16 }
 0x13b   :  { %652 = vmatpush3.xpose.msra.mxu1 %v626_v31 }
 0x13c   :  { %653 = vmatprep.subr.mxu1 %v786_v16 }
 0x13f   :  { %654 = vmatpush3.xpose.msra.mxu1 %v625_v29 }
 0x140   :  { %655 = vmatprep.subr.mxu1 %v786_v16 }
 0x143   :  { %656 = vmatpush3.xpose.msra.mxu1 %v228_v35 }
 0x144   :  { %657 = vmatprep.subr.mxu1 %v786_v16 }
 0x147   :  { %658 = vmatpush3.xpose.msra.mxu1 %v225_v30 }
 0x148   :  { %659 = vmatprep.subr.mxu1 %v786_v16 }
 0x14b   :  { %660 = vmatpush3.xpose.msra.mxu1 %v833_v21 }
 0x14c   :  { %661 = vmatprep.subr.mxu1 %v786_v16 }
 0x14f   :  { %662 = vmatpush3.xpose.msra.mxu1 %v829_v19 }
 0x150   :  { %663 = vmatprep.subr.mxu1 %v786_v16 }
 0x153   :  { %664 = vmatpush3.xpose.msra.mxu1 %v839_v25 }
 0x154   :  { %665 = vmatprep.subr.mxu1 %v786_v16 }
 0x157   :  { %666 = vmatpush3.xpose.msra.mxu1 %v831_v20 }
 0x15a   :  { %668 = vmatmul.mubr.f32.vlgmr.msra.gmra.mxu1 %v272_v59 }
 0x15b   :  { %745 = shalt.err (!%p742_p0)
}
 0x15c   :  { %454 = dma.vmem_to_hbm [thread:$0]  %s449_s28, 1024, %s891_s3, [#allocation4], %s783_s18, %s783_s18, %s784_s19  }
 0x15d   :  { %s789_s6 = smov [#allocation8]  }
 0x15e   :  { %s461_s2 = sshll.u32 %s789_s6, 4  ;;  %s462_s2 = int_to_ptr.vmem [resolvable:$true] %s461_s2 }
 0x15f   :  { %s754_s7 = scalar_lea.vmem %s462_s2, 16  ;;  %s758_s8 = scalar_lea.vmem %s462_s2, 32 }
 0x160   :  { %p755_p1 = scmp.ne.s32.totalorder %s462_s2, %s754_s7  ;;  %p759_p2 = scmp.lt.s32.totalorder %s462_s2, %s462_s2 }
 0x161   :  { %p760_p3 = scmp.lt.s32.totalorder %s758_s8, %s754_s7 }
 0x163   :  { %p761_p4 = por %p760_p3, %p759_p2 }
 0x165   :  { %p762_p5 = pnand %p761_p4, %p755_p1 }
 0x21a   :  { %v339_v60 = vpop.f32.mrf.mxu1 }
 0x21b   :  { %343 = vst [vmem:[#allocation8] sm:$0x1] %v339_v60 }
 0x21c   :  { %v669_v61 = vpop.f32.mrf.mxu1 }
 0x21d   :  { %765 = shalt.err (!%p762_p5)
}
 0x21e   :  { %464 = dma.vmem_to_hbm [thread:$0]  %s462_s2, 16, %s892_s4, [#allocation9]  }
 0x21f   :  { %778 = dma.done.wait [#allocation4], 1024  }
 0x220   :  { %779 = vsyncadd [#allocation4], 4294966272 }
 0x221   :  { %780 = dma.done.wait [#allocation9], 16  }
 0x222   :  { %781 = vsyncadd [#allocation9], 4294967280 }
 0x223   :  { %471 = vsyncpa [#allocation3], 1 }
 0x224   :  { %472 = vsyncpa [#allocation6], 1 }
 0x225   :  { %473 = vsyncpa [#allocation4], 1 }
 0x226   :  { %474 = vsyncpa [#allocation9], 1 }

</bundles_post_ra>
